<compile_context>
chip_gen: v6e
topology: v6e:2x2x1
jax: 0.10.0
libtpu: 0.0.40
codegen_flags: <defaults>
</compile_context>

<pallas_src>
import functools
import math

import jax
import jax.numpy as jnp
import numpy as np
from jax import lax
from jax.experimental import pallas as pl
from jax.experimental.pallas import tpu as pltpu


def _pick_tile(dim, target, align):
    """Largest tile <= target that divides dim and is a multiple of `align`.
    Falls back to the full dim, which is always a legal block size."""
    if dim <= target or dim % align != 0:
        return dim
    t = min(target, dim)
    t -= t % align
    while t >= align:
        if dim % t == 0:
            return t
        t -= align
    return dim


# ---------------------------------------------------------------------------
# Tiled linear kernel: y = x @ W^T + b   (W stored (F, K), like torch.nn.Linear)
# ---------------------------------------------------------------------------
def _linear_kernel(x_ref, w_ref, b_ref, o_ref, acc_ref):
    @pl.when(pl.program_id(2) == 0)
    def _():
        acc_ref[...] = jnp.zeros_like(acc_ref)

    # Contract the last dims of x (tm, tk) and w (tn, tk) directly on the MXU:
    # no in-kernel .T, bf16 operands, f32 accumulation in VMEM scratch.
    acc_ref[...] += lax.dot_general(
        x_ref[...].astype(jnp.bfloat16),
        w_ref[...].astype(jnp.bfloat16),
        dimension_numbers=(((1,), (1,)), ((), ())),
        preferred_element_type=jnp.float32,
    )

    @pl.when(pl.program_id(2) == pl.num_programs(2) - 1)
    def _():
        o_ref[...] = (acc_ref[...] + b_ref[...]).astype(o_ref.dtype)


def pallas_linear(x, w, b, out_dtype=None):
    M, K = x.shape
    F = w.shape[0]
    out_dtype = x.dtype if out_dtype is None else out_dtype

    tm = _pick_tile(M, 256, 8)      # second-minor of x / out blocks
    tn = _pick_tile(F, 512, 128)    # minor of out / bias, second-minor of w
    tk = _pick_tile(K, 512, 128)    # minor of x / w blocks (reduction axis)

    return pl.pallas_call(
        _linear_kernel,
        out_shape=jax.ShapeDtypeStruct((M, F), out_dtype),
        grid=(M // tm, F // tn, K // tk),
        in_specs=[
            pl.BlockSpec((tm, tk), lambda i, j, k: (i, k)),
            pl.BlockSpec((tn, tk), lambda i, j, k: (j, k)),
            pl.BlockSpec((1, tn), lambda i, j, k: (0, j)),
        ],
        out_specs=pl.BlockSpec((tm, tn), lambda i, j, k: (i, j)),
        scratch_shapes=[pltpu.VMEM((tm, tn), jnp.float32)],
        compiler_params=pltpu.CompilerParams(
            dimension_semantics=("parallel", "parallel", "arbitrary"),
            vmem_limit_bytes=64 * 1024 * 1024,
        ),
    )(x, w, b.reshape(1, F))


# ---------------------------------------------------------------------------
# Fused multi-head self-attention: one grid step per batch element.
# qkv block: (1, L, 3E) bf16 (lane-dense); softmax in f32; bf16 MXU matmuls.
# ---------------------------------------------------------------------------
def _attn_kernel(qkv_ref, ctx_ref, aw_ref, *, num_heads, scale):
    _, L, E3 = qkv_ref.shape
    E = E3 // 3
    Dh = E // num_heads

    qkv = qkv_ref[0]                       # (L, 3E): single lane-dense load
    q = qkv[:, 0:E] * scale                # PyTorch scales q before QK^T
    k = qkv[:, E:2 * E]
    v = qkv[:, 2 * E:3 * E]

    # TODO(synk): for very long L (v7x, 64 MiB VMEM) tile the query axis
    # flash-style (online softmax with m/l carries) and add it as a second
    # "parallel" grid axis so both v7x TensorCores are busy even when N == 1.
    ctx_heads = []
    p_sum = None
    for h in range(num_heads):             # static unroll; heads stay in-register
        sl = slice(h * Dh, (h + 1) * Dh)
        q_h, k_h, v_h = q[:, sl], k[:, sl], v[:, sl]

        # scores (L, L): contract the last dims directly (no k.T materialized)
        s = lax.dot_general(q_h, k_h, (((1,), (1,)), ((), ())),
                            preferred_element_type=jnp.float32)
        m = jnp.max(s, axis=-1, keepdims=True)
        e = jnp.exp(s - m)
        denom = jnp.sum(e, axis=-1, keepdims=True)
        p = e * pl.reciprocal(denom, approx=True)       # softmax divide on the EUP

        ctx_heads.append(jnp.dot(p.astype(jnp.bfloat16), v_h,
                                 preferred_element_type=jnp.float32))
        p_sum = p if p_sum is None else p_sum + p

    # One lane-dense (L, E) store of all heads; 1/H head-average applied once.
    ctx_ref[0] = jnp.concatenate(ctx_heads, axis=-1).astype(ctx_ref.dtype)
    aw_ref[0] = (p_sum * (1.0 / num_heads)).astype(aw_ref.dtype)

    # TODO(synk): attention-weight dropout (training mode, p > 0) not implemented;
    # semantics match eval mode / dropout=0.0 and no attn_mask / key_padding_mask.


def pallas_attention(qkv, num_heads):
    N, L, E3 = qkv.shape
    E = E3 // 3
    Dh = E // num_heads
    kernel = functools.partial(_attn_kernel, num_heads=num_heads,
                               scale=1.0 / math.sqrt(Dh))
    return pl.pallas_call(
        kernel,
        out_shape=(
            jax.ShapeDtypeStruct((N, L, E), qkv.dtype),     # context (bf16)
            jax.ShapeDtypeStruct((N, L, L), jnp.float32),   # head-averaged weights
        ),
        grid=(N,),
        in_specs=[pl.BlockSpec((1, L, E3), lambda n: (n, 0, 0))],
        out_specs=(
            pl.BlockSpec((1, L, E), lambda n: (n, 0, 0)),
            pl.BlockSpec((1, L, L), lambda n: (n, 0, 0)),
        ),
        compiler_params=pltpu.CompilerParams(
            dimension_semantics=("parallel",),
            vmem_limit_bytes=64 * 1024 * 1024,
        ),
    )(qkv)


# ---------------------------------------------------------------------------
# Full SelfAttentionLayer forward
# ---------------------------------------------------------------------------
def self_attention_layer(x, params, num_heads):
    """x: (L, N, E). Returns (out (L, N, E), attn_weights (N, L, L))."""
    L, N, E = x.shape
    assert E % num_heads == 0
    w_in, b_in, w_out, b_out = params

    # Batch-major activations for the attention hot path. Only x (and the final
    # output) are transposed; the 3x larger qkv tensor is produced batch-major.
    xb = jnp.transpose(x, (1, 0, 2)).reshape(N * L, E)

    # Fused QKV projection, emitted directly in bf16 (halves attention DMA bytes).
    qkv = pallas_linear(xb, w_in, b_in, out_dtype=jnp.bfloat16).reshape(N, L, 3 * E)

    ctx, attn_w = pallas_attention(qkv, num_heads)          # ctx: (N, L, E) bf16

    out = pallas_linear(ctx.reshape(N * L, E), w_out, b_out, out_dtype=x.dtype)
    out = jnp.transpose(out.reshape(N, L, E), (1, 0, 2))    # back to (L, N, E)
    return out, attn_w


def init_params(key, embed_size):
    k1, k2, k3, k4 = jax.random.split(key, 4)
    w_in = jax.random.normal(k1, (3 * embed_size, embed_size), jnp.float32) * 0.02
    b_in = jax.random.normal(k2, (3 * embed_size,), jnp.float32) * 0.02
    w_out = jax.random.normal(k3, (embed_size, embed_size), jnp.float32) * 0.02
    b_out = jax.random.normal(k4, (embed_size,), jnp.float32) * 0.02
    return (w_in, b_in, w_out, b_out)


def _reference(x, params, num_heads):
    """Pure-JAX reference (f32) matching nn.MultiheadAttention eval-mode forward."""
    L, N, E = x.shape
    Dh = E // num_heads
    w_in, b_in, w_out, b_out = params
    qkv = x @ w_in.T + b_in
    q, k, v = jnp.split(qkv, 3, axis=-1)

    def heads(t):                               # (L, N, E) -> (N, H, L, Dh)
        return t.reshape(L, N, num_heads, Dh).transpose(1, 2, 0, 3)

    qh = heads(q) * (1.0 / math.sqrt(Dh))
    kh, vh = heads(k), heads(v)
    s = jnp.einsum('nhqd,nhkd->nhqk', qh, kh)
    p = jax.nn.softmax(s, axis=-1)
    ctx = jnp.einsum('nhqk,nhkd->nhqd', p, vh)
    ctx = ctx.transpose(2, 0, 1, 3).reshape(L, N, E)
    out = ctx @ w_out.T + b_out
    return out, p.mean(axis=1)


if __name__ == "__main__":
    # Small shapes consistent with the module: seq_len=8, batch=2, embed=32, heads=4.
    L, N, E, H = 8, 2, 32, 4
    key = jax.random.PRNGKey(0)
    kx, kp = jax.random.split(key)

    x = jax.random.normal(kx, (L, N, E), jnp.float32)
    params = init_params(kp, E)

    fwd = jax.jit(functools.partial(self_attention_layer, num_heads=H))
    out, attn_w = fwd(x, params)
    jax.block_until_ready((out, attn_w))

    assert out.shape == (L, N, E) and out.dtype == jnp.float32
    assert attn_w.shape == (N, L, L)

    # Check against the pure-JAX reference (bf16 MXU operands -> loose tolerance).
    out_r, attn_w_r = _reference(x, params, H)
    np.testing.assert_allclose(np.asarray(out), np.asarray(out_r),
                               atol=3e-2, rtol=3e-2)
    np.testing.assert_allclose(np.asarray(attn_w), np.asarray(attn_w_r),
                               atol=3e-2, rtol=3e-2)

    print("KERNEL_OK")
</pallas_src>

<mosaic_0001>
module attributes {stable_mosaic.version = 11 : i64} {
  func.func @_attn_kernel(%arg0: i32, %arg1: memref<1x8x96xbf16, #tpu.memory_space<vmem>>, %arg2: memref<1x8x32xbf16, #tpu.memory_space<vmem>>, %arg3: memref<1x8x8xf32, #tpu.memory_space<vmem>>) attributes {dimension_semantics = [#tpu.dimension_semantics<parallel>], iteration_bounds = array<i64: 2>, scalar_prefetch = 0 : i64, scratch_operands = 0 : i64, tpu.core_type = #tpu.core_type<tc>, window_params = [{transform_indices = @transform_0, window_bounds = array<i64: 1, 8, 96>}, {transform_indices = @transform_1, window_bounds = array<i64: 1, 8, 32>}, {transform_indices = @transform_2, window_bounds = array<i64: 1, 8, 8>}]} {
    %c0 = arith.constant 0 : index
    %c0_0 = arith.constant 0 : index
    %c0_1 = arith.constant 0 : index
    %0 = vector.load %arg1[%c0, %c0_0, %c0_1] : memref<1x8x96xbf16, #tpu.memory_space<vmem>>, vector<1x8x96xbf16>
    %1 = vector.shape_cast %0 : vector<1x8x96xbf16> to vector<8x96xbf16>
    %2 = vector.extract_strided_slice %1 {offsets = [0, 0], sizes = [8, 32], strides = [1, 1]} : vector<8x96xbf16> to vector<8x32xbf16>
    %cst = arith.constant 3.535160e-01 : bf16
    %3 = vector.broadcast %cst : bf16 to vector<8x32xbf16>
    %4 = arith.mulf %2, %3 : vector<8x32xbf16>
    %5 = vector.extract_strided_slice %1 {offsets = [0, 32], sizes = [8, 32], strides = [1, 1]} : vector<8x96xbf16> to vector<8x32xbf16>
    %6 = vector.extract_strided_slice %1 {offsets = [0, 64], sizes = [8, 32], strides = [1, 1]} : vector<8x96xbf16> to vector<8x32xbf16>
    %7 = vector.extract_strided_slice %4 {offsets = [0, 0], sizes = [8, 8], strides = [1, 1]} : vector<8x32xbf16> to vector<8x8xbf16>
    %8 = vector.extract_strided_slice %5 {offsets = [0, 0], sizes = [8, 8], strides = [1, 1]} : vector<8x32xbf16> to vector<8x8xbf16>
    %9 = vector.extract_strided_slice %6 {offsets = [0, 0], sizes = [8, 8], strides = [1, 1]} : vector<8x32xbf16> to vector<8x8xbf16>
    %cst_2 = arith.constant dense<0.000000e+00> : vector<8x8xf32>
    %10 = tpu.matmul %7, %8, %cst_2 {dimension_numbers = #tpu.dot_dimension_numbers<[1], [1], [0], [0], [0, 0, 1, 0], [], []>} : vector<8x8xbf16>, vector<8x8xbf16>, vector<8x8xf32> -> vector<8x8xf32>
    %cst_3 = arith.constant dense<0xFF800000> : vector<8xf32>
    %11 = vector.multi_reduction <maximumf>, %10, %cst_3 [1] : vector<8x8xf32> to vector<8xf32>
    %12 = vector.shape_cast %11 : vector<8xf32> to vector<8x1xf32>
    %13 = vector.broadcast %12 : vector<8x1xf32> to vector<8x8xf32>
    %14 = arith.subf %10, %13 : vector<8x8xf32>
    %15 = math.exp %14 : vector<8x8xf32>
    %cst_4 = arith.constant dense<0.000000e+00> : vector<8xf32>
    %16 = vector.multi_reduction <add>, %15, %cst_4 [1] : vector<8x8xf32> to vector<8xf32>
    %17 = vector.shape_cast %16 : vector<8xf32> to vector<8x1xf32>
    %18 = tpu.reciprocal %17 {approx = true} : vector<8x1xf32> -> vector<8x1xf32>
    %19 = vector.broadcast %18 : vector<8x1xf32> to vector<8x8xf32>
    %20 = arith.mulf %15, %19 : vector<8x8xf32>
    %21 = arith.truncf %20 : vector<8x8xf32> to vector<8x8xbf16>
    %cst_5 = arith.constant dense<0.000000e+00> : vector<8x8xf32>
    %22 = tpu.matmul %21, %9, %cst_5 {dimension_numbers = #tpu.dot_dimension_numbers<[1], [0], [0], [1], [0, 0, 1, 1], [], []>} : vector<8x8xbf16>, vector<8x8xbf16>, vector<8x8xf32> -> vector<8x8xf32>
    %23 = vector.extract_strided_slice %4 {offsets = [0, 8], sizes = [8, 8], strides = [1, 1]} : vector<8x32xbf16> to vector<8x8xbf16>
    %24 = vector.extract_strided_slice %5 {offsets = [0, 8], sizes = [8, 8], strides = [1, 1]} : vector<8x32xbf16> to vector<8x8xbf16>
    %25 = vector.extract_strided_slice %6 {offsets = [0, 8], sizes = [8, 8], strides = [1, 1]} : vector<8x32xbf16> to vector<8x8xbf16>
    %cst_6 = arith.constant dense<0.000000e+00> : vector<8x8xf32>
    %26 = tpu.matmul %23, %24, %cst_6 {dimension_numbers = #tpu.dot_dimension_numbers<[1], [1], [0], [0], [0, 0, 1, 0], [], []>} : vector<8x8xbf16>, vector<8x8xbf16>, vector<8x8xf32> -> vector<8x8xf32>
    %cst_7 = arith.constant dense<0xFF800000> : vector<8xf32>
    %27 = vector.multi_reduction <maximumf>, %26, %cst_7 [1] : vector<8x8xf32> to vector<8xf32>
    %28 = vector.shape_cast %27 : vector<8xf32> to vector<8x1xf32>
    %29 = vector.broadcast %28 : vector<8x1xf32> to vector<8x8xf32>
    %30 = arith.subf %26, %29 : vector<8x8xf32>
    %31 = math.exp %30 : vector<8x8xf32>
    %cst_8 = arith.constant dense<0.000000e+00> : vector<8xf32>
    %32 = vector.multi_reduction <add>, %31, %cst_8 [1] : vector<8x8xf32> to vector<8xf32>
    %33 = vector.shape_cast %32 : vector<8xf32> to vector<8x1xf32>
    %34 = tpu.reciprocal %33 {approx = true} : vector<8x1xf32> -> vector<8x1xf32>
    %35 = vector.broadcast %34 : vector<8x1xf32> to vector<8x8xf32>
    %36 = arith.mulf %31, %35 : vector<8x8xf32>
    %37 = arith.truncf %36 : vector<8x8xf32> to vector<8x8xbf16>
    %cst_9 = arith.constant dense<0.000000e+00> : vector<8x8xf32>
    %38 = tpu.matmul %37, %25, %cst_9 {dimension_numbers = #tpu.dot_dimension_numbers<[1], [0], [0], [1], [0, 0, 1, 1], [], []>} : vector<8x8xbf16>, vector<8x8xbf16>, vector<8x8xf32> -> vector<8x8xf32>
    %39 = arith.addf %20, %36 : vector<8x8xf32>
    %40 = vector.extract_strided_slice %4 {offsets = [0, 16], sizes = [8, 8], strides = [1, 1]} : vector<8x32xbf16> to vector<8x8xbf16>
    %41 = vector.extract_strided_slice %5 {offsets = [0, 16], sizes = [8, 8], strides = [1, 1]} : vector<8x32xbf16> to vector<8x8xbf16>
    %42 = vector.extract_strided_slice %6 {offsets = [0, 16], sizes = [8, 8], strides = [1, 1]} : vector<8x32xbf16> to vector<8x8xbf16>
    %cst_10 = arith.constant dense<0.000000e+00> : vector<8x8xf32>
    %43 = tpu.matmul %40, %41, %cst_10 {dimension_numbers = #tpu.dot_dimension_numbers<[1], [1], [0], [0], [0, 0, 1, 0], [], []>} : vector<8x8xbf16>, vector<8x8xbf16>, vector<8x8xf32> -> vector<8x8xf32>
    %cst_11 = arith.constant dense<0xFF800000> : vector<8xf32>
    %44 = vector.multi_reduction <maximumf>, %43, %cst_11 [1] : vector<8x8xf32> to vector<8xf32>
    %45 = vector.shape_cast %44 : vector<8xf32> to vector<8x1xf32>
    %46 = vector.broadcast %45 : vector<8x1xf32> to vector<8x8xf32>
    %47 = arith.subf %43, %46 : vector<8x8xf32>
    %48 = math.exp %47 : vector<8x8xf32>
    %cst_12 = arith.constant dense<0.000000e+00> : vector<8xf32>
    %49 = vector.multi_reduction <add>, %48, %cst_12 [1] : vector<8x8xf32> to vector<8xf32>
    %50 = vector.shape_cast %49 : vector<8xf32> to vector<8x1xf32>
    %51 = tpu.reciprocal %50 {approx = true} : vector<8x1xf32> -> vector<8x1xf32>
    %52 = vector.broadcast %51 : vector<8x1xf32> to vector<8x8xf32>
    %53 = arith.mulf %48, %52 : vector<8x8xf32>
    %54 = arith.truncf %53 : vector<8x8xf32> to vector<8x8xbf16>
    %cst_13 = arith.constant dense<0.000000e+00> : vector<8x8xf32>
    %55 = tpu.matmul %54, %42, %cst_13 {dimension_numbers = #tpu.dot_dimension_numbers<[1], [0], [0], [1], [0, 0, 1, 1], [], []>} : vector<8x8xbf16>, vector<8x8xbf16>, vector<8x8xf32> -> vector<8x8xf32>
    %56 = arith.addf %39, %53 : vector<8x8xf32>
    %57 = vector.extract_strided_slice %4 {offsets = [0, 24], sizes = [8, 8], strides = [1, 1]} : vector<8x32xbf16> to vector<8x8xbf16>
    %58 = vector.extract_strided_slice %5 {offsets = [0, 24], sizes = [8, 8], strides = [1, 1]} : vector<8x32xbf16> to vector<8x8xbf16>
    %59 = vector.extract_strided_slice %6 {offsets = [0, 24], sizes = [8, 8], strides = [1, 1]} : vector<8x32xbf16> to vector<8x8xbf16>
    %cst_14 = arith.constant dense<0.000000e+00> : vector<8x8xf32>
    %60 = tpu.matmul %57, %58, %cst_14 {dimension_numbers = #tpu.dot_dimension_numbers<[1], [1], [0], [0], [0, 0, 1, 0], [], []>} : vector<8x8xbf16>, vector<8x8xbf16>, vector<8x8xf32> -> vector<8x8xf32>
    %cst_15 = arith.constant dense<0xFF800000> : vector<8xf32>
    %61 = vector.multi_reduction <maximumf>, %60, %cst_15 [1] : vector<8x8xf32> to vector<8xf32>
    %62 = vector.shape_cast %61 : vector<8xf32> to vector<8x1xf32>
    %63 = vector.broadcast %62 : vector<8x1xf32> to vector<8x8xf32>
    %64 = arith.subf %60, %63 : vector<8x8xf32>
    %65 = math.exp %64 : vector<8x8xf32>
    %cst_16 = arith.constant dense<0.000000e+00> : vector<8xf32>
    %66 = vector.multi_reduction <add>, %65, %cst_16 [1] : vector<8x8xf32> to vector<8xf32>
    %67 = vector.shape_cast %66 : vector<8xf32> to vector<8x1xf32>
    %68 = tpu.reciprocal %67 {approx = true} : vector<8x1xf32> -> vector<8x1xf32>
    %69 = vector.broadcast %68 : vector<8x1xf32> to vector<8x8xf32>
    %70 = arith.mulf %65, %69 : vector<8x8xf32>
    %71 = arith.truncf %70 : vector<8x8xf32> to vector<8x8xbf16>
    %cst_17 = arith.constant dense<0.000000e+00> : vector<8x8xf32>
    %72 = tpu.matmul %71, %59, %cst_17 {dimension_numbers = #tpu.dot_dimension_numbers<[1], [0], [0], [1], [0, 0, 1, 1], [], []>} : vector<8x8xbf16>, vector<8x8xbf16>, vector<8x8xf32> -> vector<8x8xf32>
    %73 = arith.addf %56, %70 : vector<8x8xf32>
    %74 = tpu.concatenate %22, %38, %55, %72 in 1 : vector<8x8xf32>, vector<8x8xf32>, vector<8x8xf32>, vector<8x8xf32> -> vector<8x32xf32>
    %75 = arith.truncf %74 : vector<8x32xf32> to vector<8x32xbf16>
    %c0_18 = arith.constant 0 : index
    %c0_19 = arith.constant 0 : index
    %c0_20 = arith.constant 0 : index
    %76 = vector.load %arg2[%c0_18, %c0_19, %c0_20] : memref<1x8x32xbf16, #tpu.memory_space<vmem>>, vector<1x8x32xbf16>
    %77 = vector.shape_cast %76 : vector<1x8x32xbf16> to vector<8x32xbf16>
    %78 = vector.shape_cast %75 : vector<8x32xbf16> to vector<1x8x32xbf16>
    tpu.vector_store %arg2[%c0_18, %c0_19, %c0_20], %78 {strides = array<i32>} : memref<1x8x32xbf16, #tpu.memory_space<vmem>>, vector<1x8x32xbf16>,
    %cst_21 = arith.constant 2.500000e-01 : f32
    %79 = vector.broadcast %cst_21 : f32 to vector<8x8xf32>
    %80 = arith.mulf %73, %79 : vector<8x8xf32>
    %c0_22 = arith.constant 0 : index
    %c0_23 = arith.constant 0 : index
    %c0_24 = arith.constant 0 : index
    %81 = vector.load %arg3[%c0_22, %c0_23, %c0_24] : memref<1x8x8xf32, #tpu.memory_space<vmem>>, vector<1x8x8xf32>
    %82 = vector.shape_cast %81 : vector<1x8x8xf32> to vector<8x8xf32>
    %83 = vector.shape_cast %80 : vector<8x8xf32> to vector<1x8x8xf32>
    tpu.vector_store %arg3[%c0_22, %c0_23, %c0_24], %83 {strides = array<i32>} : memref<1x8x8xf32, #tpu.memory_space<vmem>>, vector<1x8x8xf32>,
    return
  }
  func.func @transform_0(%arg0: i32) -> (i32, i32, i32) {
    %c0_i32 = arith.constant 0 : i32
    %c0_i32_0 = arith.constant 0 : i32
    %c0_i32_1 = arith.constant 0 : i32
    return %arg0, %c0_i32, %c0_i32_0 : i32, i32, i32
  }
  func.func @transform_1(%arg0: i32) -> (i32, i32, i32) {
    %c0_i32 = arith.constant 0 : i32
    %c0_i32_0 = arith.constant 0 : i32
    %c0_i32_1 = arith.constant 0 : i32
    return %arg0, %c0_i32, %c0_i32_0 : i32, i32, i32
  }
  func.func @transform_2(%arg0: i32) -> (i32, i32, i32) {
    %c0_i32 = arith.constant 0 : i32
    %c0_i32_0 = arith.constant 0 : i32
    %c0_i32_1 = arith.constant 0 : i32
    return %arg0, %c0_i32, %c0_i32_0 : i32, i32, i32
  }
}

module attributes {stable_mosaic.version = 11 : i64} {
  func.func @_linear_kernel(%arg0: i32, %arg1: i32, %arg2: i32, %arg3: memref<16x32xf32, #tpu.memory_space<vmem>>, %arg4: memref<96x32xf32, #tpu.memory_space<vmem>>, %arg5: memref<1x96xf32, #tpu.memory_space<vmem>>, %arg6: memref<16x96xbf16, #tpu.memory_space<vmem>>, %arg7: memref<16x96xf32, #tpu.memory_space<vmem>>) attributes {dimension_semantics = [#tpu.dimension_semantics<parallel>, #tpu.dimension_semantics<parallel>, #tpu.dimension_semantics<arbitrary>], iteration_bounds = array<i64: 1, 1, 1>, scalar_prefetch = 0 : i64, scratch_operands = 1 : i64, tpu.core_type = #tpu.core_type<tc>, window_params = [{transform_indices = @transform_0, window_bounds = array<i64: 16, 32>}, {transform_indices = @transform_1, window_bounds = array<i64: 96, 32>}, {transform_indices = @transform_2, window_bounds = array<i64: 1, 96>}, {transform_indices = @transform_3, window_bounds = array<i64: 16, 96>}]} {
    %c0_i32 = arith.constant 0 : i32
    %0 = arith.cmpi eq, %arg2, %c0_i32 : i32
    %1 = arith.extui %0 : i1 to i32
    %c0_i32_0 = arith.constant 0 : i32
    %2 = arith.cmpi ne, %1, %c0_i32_0 : i32
    scf.if %2 {
      %cst_10 = arith.constant 0.000000e+00 : f32
      %14 = vector.broadcast %cst_10 : f32 to vector<16x96xf32>
      %c0_11 = arith.constant 0 : index
      %c0_12 = arith.constant 0 : index
      %15 = vector.load %arg7[%c0_11, %c0_12] : memref<16x96xf32, #tpu.memory_space<vmem>>, vector<16x96xf32>
      tpu.vector_store %arg7[%c0_11, %c0_12], %14 {strides = array<i32>} : memref<16x96xf32, #tpu.memory_space<vmem>>, vector<16x96xf32>,
    } else {
    }
    %c0 = arith.constant 0 : index
    %c0_1 = arith.constant 0 : index
    %3 = vector.load %arg7[%c0, %c0_1] : memref<16x96xf32, #tpu.memory_space<vmem>>, vector<16x96xf32>
    %c0_2 = arith.constant 0 : index
    %c0_3 = arith.constant 0 : index
    %4 = vector.load %arg3[%c0_2, %c0_3] : memref<16x32xf32, #tpu.memory_space<vmem>>, vector<16x32xf32>
    %5 = arith.truncf %4 : vector<16x32xf32> to vector<16x32xbf16>
    %c0_4 = arith.constant 0 : index
    %c0_5 = arith.constant 0 : index
    %6 = vector.load %arg4[%c0_4, %c0_5] : memref<96x32xf32, #tpu.memory_space<vmem>>, vector<96x32xf32>
    %7 = arith.truncf %6 : vector<96x32xf32> to vector<96x32xbf16>
    %cst = arith.constant dense<0.000000e+00> : vector<16x96xf32>
    %8 = tpu.matmul %5, %7, %cst {dimension_numbers = #tpu.dot_dimension_numbers<[1], [1], [0], [0], [0, 0, 1, 0], [], []>} : vector<16x32xbf16>, vector<96x32xbf16>, vector<16x96xf32> -> vector<16x96xf32>
    %9 = arith.addf %3, %8 : vector<16x96xf32>
    %c0_6 = arith.constant 0 : index
    %c0_7 = arith.constant 0 : index
    %10 = vector.load %arg7[%c0_6, %c0_7] : memref<16x96xf32, #tpu.memory_space<vmem>>, vector<16x96xf32>
    tpu.vector_store %arg7[%c0_6, %c0_7], %9 {strides = array<i32>} : memref<16x96xf32, #tpu.memory_space<vmem>>, vector<16x96xf32>,
    %c0_i32_8 = arith.constant 0 : i32
    %11 = arith.cmpi eq, %arg2, %c0_i32_8 : i32
    %12 = arith.extui %11 : i1 to i32
    %c0_i32_9 = arith.constant 0 : i32
    %13 = arith.cmpi ne, %12, %c0_i32_9 : i32
    scf.if %13 {
      %c0_10 = arith.constant 0 : index
      %c0_11 = arith.constant 0 : index
      %14 = vector.load %arg7[%c0_10, %c0_11] : memref<16x96xf32, #tpu.memory_space<vmem>>, vector<16x96xf32>
      %c0_12 = arith.constant 0 : index
      %c0_13 = arith.constant 0 : index
      %15 = vector.load %arg5[%c0_12, %c0_13] : memref<1x96xf32, #tpu.memory_space<vmem>>, vector<1x96xf32>
      %16 = vector.broadcast %15 : vector<1x96xf32> to vector<16x96xf32>
      %17 = arith.addf %14, %16 : vector<16x96xf32>
      %18 = arith.truncf %17 : vector<16x96xf32> to vector<16x96xbf16>
      %c0_14 = arith.constant 0 : index
      %c0_15 = arith.constant 0 : index
      %19 = vector.load %arg6[%c0_14, %c0_15] : memref<16x96xbf16, #tpu.memory_space<vmem>>, vector<16x96xbf16>
      tpu.vector_store %arg6[%c0_14, %c0_15], %18 {strides = array<i32>} : memref<16x96xbf16, #tpu.memory_space<vmem>>, vector<16x96xbf16>,
    } else {
    }
    return
  }
  func.func @transform_0(%arg0: i32, %arg1: i32, %arg2: i32) -> (i32, i32) {
    %c0_i32 = arith.constant 0 : i32
    return %arg0, %arg2 : i32, i32
  }
  func.func @transform_1(%arg0: i32, %arg1: i32, %arg2: i32) -> (i32, i32) {
    %c0_i32 = arith.constant 0 : i32
    return %arg1, %arg2 : i32, i32
  }
  func.func @transform_2(%arg0: i32, %arg1: i32, %arg2: i32) -> (i32, i32) {
    %c0_i32 = arith.constant 0 : i32
    %c0_i32_0 = arith.constant 0 : i32
    return %c0_i32, %arg1 : i32, i32
  }
  func.func @transform_3(%arg0: i32, %arg1: i32, %arg2: i32) -> (i32, i32) {
    %c0_i32 = arith.constant 0 : i32
    return %arg0, %arg1 : i32, i32
  }
}

module attributes {stable_mosaic.version = 11 : i64} {
  func.func @_linear_kernel(%arg0: i32, %arg1: i32, %arg2: i32, %arg3: memref<16x32xbf16, #tpu.memory_space<vmem>>, %arg4: memref<32x32xf32, #tpu.memory_space<vmem>>, %arg5: memref<1x32xf32, #tpu.memory_space<vmem>>, %arg6: memref<16x32xf32, #tpu.memory_space<vmem>>, %arg7: memref<16x32xf32, #tpu.memory_space<vmem>>) attributes {dimension_semantics = [#tpu.dimension_semantics<parallel>, #tpu.dimension_semantics<parallel>, #tpu.dimension_semantics<arbitrary>], iteration_bounds = array<i64: 1, 1, 1>, scalar_prefetch = 0 : i64, scratch_operands = 1 : i64, tpu.core_type = #tpu.core_type<tc>, window_params = [{transform_indices = @transform_0, window_bounds = array<i64: 16, 32>}, {transform_indices = @transform_1, window_bounds = array<i64: 32, 32>}, {transform_indices = @transform_2, window_bounds = array<i64: 1, 32>}, {transform_indices = @transform_3, window_bounds = array<i64: 16, 32>}]} {
    %c0_i32 = arith.constant 0 : i32
    %0 = arith.cmpi eq, %arg2, %c0_i32 : i32
    %1 = arith.extui %0 : i1 to i32
    %c0_i32_0 = arith.constant 0 : i32
    %2 = arith.cmpi ne, %1, %c0_i32_0 : i32
    scf.if %2 {
      %cst_10 = arith.constant 0.000000e+00 : f32
      %13 = vector.broadcast %cst_10 : f32 to vector<16x32xf32>
      %c0_11 = arith.constant 0 : index
      %c0_12 = arith.constant 0 : index
      %14 = vector.load %arg7[%c0_11, %c0_12] : memref<16x32xf32, #tpu.memory_space<vmem>>, vector<16x32xf32>
      tpu.vector_store %arg7[%c0_11, %c0_12], %13 {strides = array<i32>} : memref<16x32xf32, #tpu.memory_space<vmem>>, vector<16x32xf32>,
    } else {
    }
    %c0 = arith.constant 0 : index
    %c0_1 = arith.constant 0 : index
    %3 = vector.load %arg7[%c0, %c0_1] : memref<16x32xf32, #tpu.memory_space<vmem>>, vector<16x32xf32>
    %c0_2 = arith.constant 0 : index
    %c0_3 = arith.constant 0 : index
    %4 = vector.load %arg3[%c0_2, %c0_3] : memref<16x32xbf16, #tpu.memory_space<vmem>>, vector<16x32xbf16>
    %c0_4 = arith.constant 0 : index
    %c0_5 = arith.constant 0 : index
    %5 = vector.load %arg4[%c0_4, %c0_5] : memref<32x32xf32, #tpu.memory_space<vmem>>, vector<32x32xf32>
    %6 = arith.truncf %5 : vector<32x32xf32> to vector<32x32xbf16>
    %cst = arith.constant dense<0.000000e+00> : vector<16x32xf32>
    %7 = tpu.matmul %4, %6, %cst {dimension_numbers = #tpu.dot_dimension_numbers<[1], [1], [0], [0], [0, 0, 1, 0], [], []>} : vector<16x32xbf16>, vector<32x32xbf16>, vector<16x32xf32> -> vector<16x32xf32>
    %8 = arith.addf %3, %7 : vector<16x32xf32>
    %c0_6 = arith.constant 0 : index
    %c0_7 = arith.constant 0 : index
    %9 = vector.load %arg7[%c0_6, %c0_7] : memref<16x32xf32, #tpu.memory_space<vmem>>, vector<16x32xf32>
    tpu.vector_store %arg7[%c0_6, %c0_7], %8 {strides = array<i32>} : memref<16x32xf32, #tpu.memory_space<vmem>>, vector<16x32xf32>,
    %c0_i32_8 = arith.constant 0 : i32
    %10 = arith.cmpi eq, %arg2, %c0_i32_8 : i32
    %11 = arith.extui %10 : i1 to i32
    %c0_i32_9 = arith.constant 0 : i32
    %12 = arith.cmpi ne, %11, %c0_i32_9 : i32
    scf.if %12 {
      %c0_10 = arith.constant 0 : index
      %c0_11 = arith.constant 0 : index
      %13 = vector.load %arg7[%c0_10, %c0_11] : memref<16x32xf32, #tpu.memory_space<vmem>>, vector<16x32xf32>
      %c0_12 = arith.constant 0 : index
      %c0_13 = arith.constant 0 : index
      %14 = vector.load %arg5[%c0_12, %c0_13] : memref<1x32xf32, #tpu.memory_space<vmem>>, vector<1x32xf32>
      %15 = vector.broadcast %14 : vector<1x32xf32> to vector<16x32xf32>
      %16 = arith.addf %13, %15 : vector<16x32xf32>
      %c0_14 = arith.constant 0 : index
      %c0_15 = arith.constant 0 : index
      %17 = vector.load %arg6[%c0_14, %c0_15] : memref<16x32xf32, #tpu.memory_space<vmem>>, vector<16x32xf32>
      tpu.vector_store %arg6[%c0_14, %c0_15], %16 {strides = array<i32>} : memref<16x32xf32, #tpu.memory_space<vmem>>, vector<16x32xf32>,
    } else {
    }
    return
  }
  func.func @transform_0(%arg0: i32, %arg1: i32, %arg2: i32) -> (i32, i32) {
    %c0_i32 = arith.constant 0 : i32
    return %arg0, %arg2 : i32, i32
  }
  func.func @transform_1(%arg0: i32, %arg1: i32, %arg2: i32) -> (i32, i32) {
    %c0_i32 = arith.constant 0 : i32
    return %arg1, %arg2 : i32, i32
  }
  func.func @transform_2(%arg0: i32, %arg1: i32, %arg2: i32) -> (i32, i32) {
    %c0_i32 = arith.constant 0 : i32
    %c0_i32_0 = arith.constant 0 : i32
    return %c0_i32, %arg1 : i32, i32
  }
  func.func @transform_3(%arg0: i32, %arg1: i32, %arg2: i32) -> (i32, i32) {
    %c0_i32 = arith.constant 0 : i32
    return %arg0, %arg1 : i32, i32
  }
}

</mosaic_0001>

<bundles_post_ra>
// kernel: self_attention_layer.3
= control target key start
LH: loop header
LB: loop body
LE: loop exit
PB: predicated region body
PF: predicated region fallthrough
CT: control target
= control target key end

     0   :  { %vm19_vm0 = vcmask 785408   ;;  %v173_v0 = vmov 0.0   ;;  %vm45_vm1 = vcmask 261120   ;;  %vm174_vm2 = vmmov 0   ;;  %s257_s1 = inlined_call_operand.vmem [shape: f32[96,32], index: 1, kind: input, shape index: {}]   ;;  %s258_s0 = inlined_call_operand.vmem [shape: f32[16,32], index: 0, kind: input, shape index: {}]   ;;  %s259_s2 = inlined_call_operand.vmem [shape: f32[1,96], index: 2, kind: input, shape index: {}]   ;;  %s260_s3 = inlined_call_operand.vmem [shape: bf16[16,96], index: 3, kind: output, shape index: {}]  }
   0x1   :  { %155 = vmatprep.subr.bf16.mxu0 %v173_v0  ;;  %v37_v1 = vld [vmem:[%s257_s1 + $0x50] sm:$0xff]  ;;  %v38_v2 = vld [vmem:[%s257_s1 + $0x58] sm:$0xff]  ;;  %167 = vmatprep.mubr.msk.bf16.mxu0 %vm174_vm2, %v173_v0  ;;  %20 = vst.msk [vmem:[#allocation2] sm:$0xff] %vm19_vm0, %v173_v0  ;;  %21 = vst.msk [vmem:[#allocation2 + $0x8] sm:$0xff] %vm19_vm0, %v173_v0  ;;  %vm135_vm3 = vcmask 781312  }
   0x2   :  { %v44_v3 = vpack.c.bf16 %v38_v2, %v37_v1  ;;  %v35_v4 = vld [vmem:[%s257_s1 + $0x40] sm:$0xff]  ;;  %v36_v5 = vld [vmem:[%s257_s1 + $0x48] sm:$0xff]  ;;  %v33_v9 = vld [vmem:[%s257_s1 + $0x30] sm:$0xff] }
   0x3   :  { %v43_v7 = vpack.c.bf16 %v36_v5, %v35_v4  ;;  %v34_v10 = vld [vmem:[%s257_s1 + $0x38] sm:$0xff]  ;;  %v31_v13 = vld [vmem:[%s257_s1 + $0x20] sm:$0xff]  ;;  %v32_v14 = vld [vmem:[%s257_s1 + $0x28] sm:$0xff] }
   0x4   :  { %v65_v6 = vsel %vm45_vm1, %v44_v3, 0  ;;  %v42_v11 = vpack.c.bf16 %v34_v10, %v33_v9  ;;  %v41_v15 = vpack.c.bf16 %v32_v14, %v31_v13  ;;  %v29_v17 = vld [vmem:[%s257_s1 + $0x10] sm:$0xff]  ;;  %v30_v18 = vld [vmem:[%s257_s1 + $0x18] sm:$0xff]  ;;  %v27_v21 = vld [vmem:[%s257_s1] sm:$0xff] }
   0x5   :  { %156 = vmatpush3.bf16.xpose.msra.mxu0 %v65_v6  ;;  %v62_v8 = vsel %vm45_vm1, %v43_v7, 0  ;;  %v40_v19 = vpack.c.bf16 %v30_v18, %v29_v17  ;;  %v28_v22 = vld [vmem:[%s257_s1 + $0x8] sm:$0xff]  ;;  %v24_v25 = vld [vmem:[%s258_s0] sm:$0xff] }
   0x6   :  { %157 = vmatprep.subr.bf16.mxu0 %v173_v0  ;;  %v59_v12 = vsel %vm45_vm1, %v42_v11, 0  ;;  %v56_v16 = vsel %vm45_vm1, %v41_v15, 0  ;;  %v39_v23 = vpack.c.bf16 %v28_v22, %v27_v21  ;;  %v25_v26 = vld [vmem:[%s258_s0 + $0x8] sm:$0xff]  ;;  %v143_v36 = vld [vmem:[%s259_s2] ss:$0 sm:$0xff] }
   0x7   :  { %v53_v20 = vsel %vm45_vm1, %v40_v19, 0  ;;  %v26_v27 = vpack.c.bf16 %v25_v26, %v24_v25 }
   0x8   :  { %v50_v24 = vsel %vm45_vm1, %v39_v23, 0  ;;  %v22_v28 = vld [vmem:[#allocation2] sm:$0xff]  ;;  %v23_v32 = vld [vmem:[#allocation2 + $0x8] sm:$0xff] }
   0xd   :  { %158 = vmatpush3.bf16.xpose.msra.mxu0 %v62_v8 }
   0xe   :  { %159 = vmatprep.subr.bf16.mxu0 %v173_v0 }
  0x15   :  { %160 = vmatpush3.bf16.xpose.msra.mxu0 %v59_v12 }
  0x16   :  { %161 = vmatprep.subr.bf16.mxu0 %v173_v0 }
  0x1d   :  { %162 = vmatpush3.bf16.xpose.msra.mxu0 %v56_v16 }
  0x1e   :  { %163 = vmatprep.subr.bf16.mxu0 %v173_v0 }
  0x25   :  { %164 = vmatpush3.bf16.xpose.msra.mxu0 %v53_v20 }
  0x26   :  { %165 = vmatprep.subr.bf16.mxu0 %v173_v0 }
  0x2d   :  { %166 = vmatpush3.bf16.xpose.msra.mxu0 %v50_v24 }
  0x34   :  { %168 = vmatmul.mubr.msk.bf16.vlgmr.msra.gmra.mxu0 %vm45_vm1, %v26_v27 }
  0xf4   :  { %v101_v29 = vpop.f32.mrf.mxu0 }
  0xf5   :  { %v108_v30 = vadd.f32 %v101_v29, %v22_v28 }
  0xf6   :  { %v169_v31 = vpop.f32.mrf.mxu0 }
  0xf7   :  { %111 = vst.msk [vmem:[#allocation2] sm:$0xff] %vm19_vm0, %v108_v30 }
  0xf8   :  { %v104_v33 = vpop.f32.mrf.mxu0 }
  0xf9   :  { %v109_v34 = vadd.f32 %v104_v33, %v23_v32 }
  0xfa   :  { %v170_v35 = vpop.f32.mrf.mxu0 }
  0xfb   :  { %112 = vst.msk [vmem:[#allocation2 + $0x8] sm:$0xff] %vm19_vm0, %v109_v34 }
  0xfe   :  { %v116_v37 = vld [vmem:[#allocation2] sm:$0xff] }
  0xff   :  { %v125_v38 = vadd.f32 %v143_v36, %v116_v37 }
 0x101   :  { %v146_v39 = vpack.c.bf16 %v125_v38, %v125_v38 }
 0x102   :  { %v117_v40 = vld [vmem:[#allocation2 + $0x8] sm:$0xff] }
 0x103   :  { %136 = vst.msk [vmem:[%s260_s3] sm:$0xf] %vm135_vm3, %v146_v39  ;;  %v126_v41 = vadd.f32 %v143_v36, %v117_v40 }
 0x105   :  { %v147_v42 = vpack.c.bf16 %v126_v41, %v126_v41 }
 0x107   :  { %137 = vst.msk [vmem:[%s260_s3 + $0x4] sm:$0xf] %vm135_vm3, %v147_v42 }

// kernel: self_attention_layer.4
= control target key start
LH: loop header
LB: loop body
LE: loop exit
PB: predicated region body
PF: predicated region fallthrough
CT: control target
= control target key end

     0   :  { %8 = vsyncpa [#allocation3], 0  ;;  %s1155_s0 = inlined_call_operand.vmem [shape: bf16[2,8,96], index: 0, kind: input, shape index: {}]   ;;  %s1156_s1 = inlined_call_operand.vmem [shape: bf16[2,8,32], index: 1, kind: output, shape index: {0}]   ;;  %s1157_s2 = inlined_call_operand.hbm [shape: f32[2,8,8], index: 2, kind: output, shape index: {1}]  }
   0x1   :  { %10 = vsyncpa [#allocation3 + $0x1], 0  ;;  %s980_s9 = smov 0   ;;  %s982_s10 = smov 0  }
   0x2   :  { %s984_s11 = smov 0   ;;  %s986_s12 = smov 0  }
   0x3 LB: > { %s1001_s13 = sadd.s32 4294967295, %s946_s12   ;;  %s729_s14 = sadd.s32 4294967294, %s946_s12   ;;  %s946_s12 = sphi %s986_s12, %s1163_s12   ;;  %s942_s11 = sphi %s984_s11, %s1162_s11   ;;  %s938_s10 = sphi %s982_s10, %s1161_s10   ;;  %s934_s9 = sphi %s980_s9, %s1160_s9  }
   0x4   : > { %s1005_s15 = sadd.s32 1, %s946_s12   ;;  %s75_s16 = sadd.s32 1, %s942_s11 }
   0x5   : > { %s72_s17 = ssub.s32 %s946_s12, %s1005_s15  ;;  %p85_p0 = scmp.ne.s32.totalorder %s942_s11, %s938_s10 }
   0x6   : > { %p73_p1 = scmp.eq.s32.totalorder %s72_s17, 0  ;;  %p86_p2 = scmp.eq.s32.totalorder %s1001_s13, 1 }
   0x7   : > { %p91_p3 = scmp.ne.s32.totalorder %s938_s10, %s934_s9  ;;  %p92_p4 = scmp.eq.s32.totalorder %s729_s14, 1 }
   0x8   : > { %s1016_s18 = scalar_select %p73_p1, %s942_s11, %s75_s16  }
   0x9   : > { %p1018_p5 = por %p86_p2, %p85_p0  ;;  %p1022_p6 = por %p92_p4, %p91_p3 }
   0xa   : > { %p732_p7 = scmp.ge.s32.totalorder %s946_s12, 1  ;;  %p117_p8 = scmp.lt.s32.totalorder %s946_s12, 3 }
   0xc   : > { %p118_p9 = pnand %p732_p7, %p117_p8 }
   0xd   : > { %p142_p10 = scmp.lt.s32.totalorder (!%p118_p9), %s1001_s13, 1  ;;  %s950_s26 = smov (!%p118_p9), 96  }
   0xe   : > { %121 = sbr.rel (%p118_p9) target bundleno = 1555 (0x613), region = 24  ;;  %s951_s27 = smov (!%p118_p9), 64  }
   0xf   : > { %s952_s28 = smov (!%p118_p9), 88   ;;  %s953_s29 = smov (!%p118_p9), 72  }
  0x10   : > { %s954_s30 = smov (!%p118_p9), 120   ;;  %s955_s3 = smov (!%p118_p9), 80  }
  0x11   : > { %s956_s4 = smov (!%p118_p9), 112   ;;  %s957_s5 = smov (!%p118_p9), 104  }
  0x12   : > { %s958_s6 = smov (!%p118_p9), 56   ;;  %s959_s7 = smov (!%p118_p9), 48  }
  0x13   : > { %v948_v0 = vmov 0.0   ;;  %vm949_vm0 = vmmov 0   ;;  %s1033_s21 = scalar_select %p142_p10, %s1001_s13, 1  ;;  %vm159_vm1 = vcmask 64512   ;;  %vm223_vm2 = vcmask 1043456  }
  0x14   : > { %766 = vmatprep.subr.bf16.mxu0 %v948_v0  ;;  %768 = vmatprep.mubr.msk.bf16.mxu0 %vm949_vm0, %v948_v0  ;;  %s960_s8 = smov 40   ;;  %s139_s14 = sand.u32 1, %s938_s10  }
  0x15   : > { %772 = vmatprep.subr.bf16.mxu1 %v948_v0  ;;  %774 = vmatprep.mubr.msk.bf16.mxu1 %vm949_vm0, %v948_v0  ;;  %s734_s22 = sshll.u32 %s1033_s21, 2  ;;  %s733_s16 = sshll.u32 %s139_s14, 3 }
  0x16   : > { %s145_s25 = scalar_lea.vmem %s1155_s0, %s734_s22  ;;  %s141_s17 = scalar_lea.vmem [#allocation2], %s733_s16 }
  0x17   : > { %v152_v1 = vld [vmem:[%s145_s25] sm:$0xf]  ;;  %s961_s23 = smov 8   ;;  %s747_s24 = sshll.u32 %s1001_s13, 7 }
  0x18   : > { %v1044_v2 = vcombine.low %v152_v1, %v152_v1  ;;  %v153_v5 = vmul.bf16 1052065461, %v152_v1  ;;  %s646_s25 = sshll.u32 %s141_s17, 4  ;;  %s647_s25 = int_to_ptr.vmem [resolvable:$true] %s646_s25 }
  0x1a   : > { %157 = vrot.lane.b32.xlu0 %v1044_v2, %s950_s26  ;;  %218 = vrot.lane.b32.xlu1 %v1044_v2, %s951_s27  ;;  %v739_v18 = vcombine.low %v153_v5, %v153_v5 }
  0x1e   : > { %272 = vrot.lane.b32.xlu1 %v1044_v2, %s952_s28  ;;  %s1111_s28 = scalar_lea.hbm %s1157_s2, %s747_s24 }
  0x8c   : > { %v158_v3 = vpop.permute.xlu0 %157  ;;  %v219_v11 = vpop.permute.xlu1 %218 }
  0x8d   : > { %v164_v4 = vsel %vm159_vm1, %v158_v3, 0  ;;  %v225_v12 = vsel %vm223_vm2, %v219_v11, 0 }
  0x8e   : > { %767 = vmatpush3.bf16.xpose.msra.mxu0 %v164_v4  ;;  %773 = vmatpush3.bf16.msra.mxu1 %v225_v12 }
  0x8f   : > { %784 = vmatprep.subr.bf16.mxu0 %v948_v0  ;;  %778 = vmatprep.subr.bf16.mxu1 %v948_v0 }
  0x90   : > { %v273_v19 = vpop.permute.xlu1 %272 }
  0x91   : > { %v278_v25 = vsel %vm159_vm1, %v273_v19, 0 }
  0x95   : > { %769 = vmatmul.mubr.msk.bf16.vlgmr.msra.gmra.mxu0 %vm159_vm1, %v153_v5 }
  0x96   : > { %786 = vmatprep.mubr.msk.bf16.mxu0 %vm949_vm0, %v948_v0 }
 0x155   : > { %v200_v6 = vpop.f32.mrf.mxu0 }
 0x156   : > { %v206_v7 = vsel %vm159_vm1, %v200_v6, -inf }
 0x157   : > { %207 = vmax.xlane.f32.xlu0 %v206_v7  ;;  %v770_v8 = vpop.f32.mrf.mxu0 }
 0x159   : > { %v203_v9 = vpop.f32.mrf.mxu0 }
 0x15b   : > { %v771_v10 = vpop.f32.mrf.mxu0 }
 0x16d   : > { %494 = vrot.lane.b32.xlu0 %v1044_v2, %s953_s29  ;;  %s962_s29 = smov 16  }
 0x1e0   : > { %v208_v13 = vpop.xlane.xlu0 %207 }
 0x1e1   : > { %v209_v14 = vsub.f32 %v200_v6, %v208_v13 }
 0x1e3   : > { %v210_v15 = vmul.f32 1.442695, %v209_v14 }
 0x1e4   : > { %v495_v28 = vpop.permute.xlu0 %494 }
 0x1e5   : > { %870 = vpow2.f32 %v210_v15  ;;  %v500_v30 = vsel %vm159_vm1, %v495_v28, 0 }
 0x1f2   : > { %v871_v16 = vpop.eup %870 }
 0x1f3   : > { %v212_v17 = vsel %vm159_vm1, %v871_v16, 0.0 }
 0x1f4   : > { %213 = vadd.xlane.f32.xlu1 %v212_v17 }
 0x205   : > { %270 = vrot.lane.b32.xlu1 %v739_v18, %s954_s30  ;;  %s630_s30 = scalar_lea.sflag [#allocation3], %s139_s14 }
 0x209   : > { %383 = vrot.lane.b32.xlu1 %v1044_v2, %s955_s3  ;;  %s886_s3 = scalar_lea.vmem %s647_s25, 128 }
 0x20a   : > { %p887_p11 = scmp.ne.s32.totalorder %s647_s25, %s886_s3 }
 0x20c   : > { %p888_p12 = pnand %p887_p11, %p1018_p5 }
 0x20d   : > { %381 = vrot.lane.b32.xlu1 %v739_v18, %s956_s4  ;;  %s963_s4 = smov [#allocation2]  }
 0x20e   : > { %p889_p13 = pneg %p888_p12 }
 0x211   : > { %492 = vrot.lane.b32.xlu1 %v739_v18, %s957_s5  ;;  %s890_s5 = sshll.u32 %s963_s4, 4  ;;  %s891_s5 = int_to_ptr.vmem [resolvable:$false] %s890_s5 }
 0x212   : > { %s892_s13 = scalar_lea.vmem %s891_s5, 256  ;;  %p893_p0 = scmp.lt.s32.totalorder %s647_s25, %s891_s5 }
 0x213   : > { %p894_p1 = scmp.lt.s32.totalorder %s892_s13, %s886_s3 }
 0x215   : > { %p895_p2 = por %p894_p1, %p893_p0 }
 0x217   : > { %p896_p3 = pnand %p895_p2, %p889_p13 }
 0x27d   : > { %v214_v20 = vpop.xlane.xlu1 %213 }
 0x27e   : > { %872 = vrcp.f32 %v214_v20 }
 0x281   : > { %v271_v23 = vpop.permute.xlu1 %270 }
 0x285   : > { %v384_v26 = vpop.permute.xlu1 %383 }
 0x286   : > { %v389_v27 = vsel %vm159_vm1, %v384_v26, 0 }
 0x289   : > { %v382_v29 = vpop.permute.xlu1 %381 }
 0x28b   : > { %v873_v21 = vpop.eup %872 }
 0x28c   : > { %v1060_v22 = vmul.f32 %v873_v21, %v871_v16 }
 0x28d   : > { %v493_v31 = vpop.permute.xlu1 %492 }
 0x28e   : > { %v217_v24 = vpack.c.bf16 %v1060_v22, %v1060_v22 }
 0x290   : > { %775 = vmatmul.mubr.msk.bf16.vlgmr.msra.gmra.mxu1 %vm159_vm1, %v217_v24 }
 0x291   : > { %779 = vmatpush3.bf16.xpose.msra.mxu1 %v278_v25  ;;  %780 = vmatprep.mubr.msk.bf16.mxu1 %vm949_vm0, %v948_v0 }
 0x292   : > { %790 = vmatprep.subr.bf16.mxu1 %v948_v0 }
 0x298   : > { %781 = vmatmul.mubr.msk.bf16.vlgmr.msra.gmra.mxu1 %vm159_vm1, %v271_v23 }
 0x299   : > { %791 = vmatpush3.bf16.xpose.msra.mxu1 %v389_v27  ;;  %792 = vmatprep.mubr.msk.bf16.mxu1 %vm949_vm0, %v948_v0 }
 0x29a   : > { %802 = vmatprep.subr.bf16.mxu1 %v948_v0 }
 0x2a0   : > { %793 = vmatmul.mubr.msk.bf16.vlgmr.msra.gmra.mxu1 %vm159_vm1, %v382_v29 }
 0x2a1   : > { %803 = vmatpush3.bf16.xpose.msra.mxu1 %v500_v30  ;;  %804 = vmatprep.mubr.msk.bf16.mxu1 %vm949_vm0, %v948_v0 }
 0x2a8   : > { %805 = vmatmul.mubr.msk.bf16.vlgmr.msra.gmra.mxu1 %vm159_vm1, %v493_v31 }
 0x350   : > { %v1079_v32 = vpop.f32.mrf.mxu1 }
 0x352   : > { %v776_v33 = vpop.f32.mrf.mxu1 }
 0x354   : > { %v264_v34 = vpop.f32.mrf.mxu1 }
 0x356   : > { %v777_v35 = vpop.f32.mrf.mxu1 }
 0x358   : > { %v314_v36 = vpop.f32.mrf.mxu1 }
 0x359   : > { %v320_v37 = vsel %vm159_vm1, %v314_v36, -inf }
 0x35a   : > { %321 = vmax.xlane.f32.xlu1 %v320_v37  ;;  %v782_v38 = vpop.f32.mrf.mxu1 }
 0x35c   : > { %v317_v39 = vpop.f32.mrf.mxu1 }
 0x35e   : > { %v783_v40 = vpop.f32.mrf.mxu1 }
 0x360   : > { %v425_v41 = vpop.f32.mrf.mxu1 }
 0x361   : > { %v431_v42 = vsel %vm159_vm1, %v425_v41, -inf }
 0x362   : > { %432 = vmax.xlane.f32.xlu0 %v431_v42  ;;  %v794_v43 = vpop.f32.mrf.mxu1 }
 0x364   : > { %v428_v44 = vpop.f32.mrf.mxu1 }
 0x366   : > { %v795_v45 = vpop.f32.mrf.mxu1 }
 0x368   : > { %v536_v46 = vpop.f32.mrf.mxu1 }
 0x369   : > { %v542_v47 = vsel %vm159_vm1, %v536_v46, -inf }
 0x36a   : > { %543 = vmax.xlane.f32.xlu1 %v542_v47  ;;  %v806_v48 = vpop.f32.mrf.mxu1 }
 0x36c   : > { %v539_v49 = vpop.f32.mrf.mxu1 }
 0x36e   : > { %v807_v50 = vpop.f32.mrf.mxu1 }
 0x3e3   : > { %v322_v51 = vpop.xlane.xlu1 %321 }
 0x3e4   : > { %v323_v52 = vsub.f32 %v314_v36, %v322_v51 }
 0x3e6   : > { %v324_v53 = vmul.f32 1.442695, %v323_v52 }
 0x3e8   : > { %874 = vpow2.f32 %v324_v53 }
 0x3eb   : > { %v433_v61 = vpop.xlane.xlu0 %432 }
 0x3ec   : > { %v434_v62 = vsub.f32 %v425_v41, %v433_v61 }
 0x3ee   : > { %v435_v63 = vmul.f32 1.442695, %v434_v62 }
 0x3f3   : > { %v544_v54 = vpop.xlane.xlu1 %543 }
 0x3f4   : > { %v545_v55 = vsub.f32 %v536_v46, %v544_v54 }
 0x3f5   : > { %v875_v56 = vpop.eup %874 }
 0x3f6   : > { %v546_v57 = vmul.f32 1.442695, %v545_v55  ;;  %v326_v58 = vsel %vm159_vm1, %v875_v56, 0.0 }
 0x3f7   : > { %327 = vadd.xlane.f32.xlu1 %v326_v58 }
 0x3f8   : > { %876 = vpow2.f32 %v546_v57 }
 0x3f9   : > { %878 = vpow2.f32 %v435_v63 }
 0x405   : > { %v877_v59 = vpop.eup %876 }
 0x406   : > { %v548_v60 = vsel %vm159_vm1, %v877_v59, 0.0  ;;  %v879_v1 = vpop.eup %878 }
 0x407   : > { %549 = vadd.xlane.f32.xlu0 %v548_v60  ;;  %v437_v3 = vsel %vm159_vm1, %v879_v1, 0.0 }
 0x408   : > { %332 = vrot.lane.b32.xlu1 %v1044_v2, %s958_s6 }
 0x41d   : > { %443 = vrot.lane.b32.xlu0 %v1044_v2, %s959_s7 }
 0x42c   : > { %438 = vadd.xlane.f32.xlu1 %v437_v3 }
 0x43d   : > { %554 = vrot.lane.b32.xlu1 %v1044_v2, %s960_s8 }
 0x480   : > { %v328_v4 = vpop.xlane.xlu1 %327 }
 0x481   : > { %880 = vrcp.f32 %v328_v4 }
 0x484   : > { %v333_v5 = vpop.permute.xlu1 %332 }
 0x485   : > { %v338_v6 = vsel %vm223_vm2, %v333_v5, 0 }
 0x486   : > { %785 = vmatpush3.bf16.msra.mxu0 %v338_v6 }
 0x487   : > { %796 = vmatprep.subr.bf16.mxu0 %v948_v0 }
 0x48e   : > { %v881_v7 = vpop.eup %880 }
 0x48f   : > { %v330_v8 = vmul.f32 %v881_v7, %v875_v56 }
 0x490   : > { %v550_v9 = vpop.xlane.xlu0 %549 }
 0x491   : > { %v331_v10 = vpack.c.bf16 %v330_v8, %v330_v8  ;;  %882 = vrcp.f32 %v550_v9  ;;  %v380_v17 = vadd.f32 %v330_v8, %v1060_v22 }
 0x493   : > { %787 = vmatmul.mubr.msk.bf16.vlgmr.msra.gmra.mxu0 %vm159_vm1, %v331_v10 }
 0x494   : > { %v444_v11 = vpop.permute.xlu0 %443  ;;  %798 = vmatprep.mubr.msk.bf16.mxu0 %vm949_vm0, %v948_v0 }
 0x495   : > { %v449_v2 = vsel %vm223_vm2, %v444_v11, 0 }
 0x496   : > { %797 = vmatpush3.bf16.msra.mxu0 %v449_v2 }
 0x497   : > { %808 = vmatprep.subr.bf16.mxu0 %v948_v0 }
 0x49e   : > { %v883_v13 = vpop.eup %882 }
 0x49f   : > { %v552_v20 = vmul.f32 %v883_v13, %v877_v59 }
 0x4a1   : > { %v553_v22 = vpack.c.bf16 %v552_v20, %v552_v20 }
 0x4b5   : > { %v439_v12 = vpop.xlane.xlu1 %438 }
 0x4b6   : > { %884 = vrcp.f32 %v439_v12 }
 0x4b9   : > { %v555_v15 = vpop.permute.xlu1 %554 }
 0x4ba   : > { %v560_v18 = vsel %vm223_vm2, %v555_v15, 0 }
 0x4c3   : > { %v885_v14 = vpop.eup %884 }
 0x4c4   : > { %v441_v16 = vmul.f32 %v885_v14, %v879_v1 }
 0x4c6   : > { %v442_v19 = vpack.c.bf16 %v441_v16, %v441_v16  ;;  %v491_v21 = vadd.f32 %v441_v16, %v380_v17 }
 0x4c8   : > { %799 = vmatmul.mubr.msk.bf16.vlgmr.msra.gmra.mxu0 %vm159_vm1, %v442_v19  ;;  %v602_v23 = vadd.f32 %v552_v20, %v491_v21 }
 0x4c9   : > { %809 = vmatpush3.bf16.msra.mxu0 %v560_v18  ;;  %810 = vmatprep.mubr.msk.bf16.mxu0 %vm949_vm0, %v948_v0 }
 0x4ca   : > { %v623_v24 = vmul.f32 0.25, %v602_v23 }
 0x4cc   : > { %624 = vst.msk [vmem:[%s141_s17] sm:$0xff] %vm159_vm1, %v623_v24 }
 0x4d0   : > { %811 = vmatmul.mubr.msk.bf16.vlgmr.msra.gmra.mxu0 %vm159_vm1, %v553_v22 }
 0x553   : > { %v374_v25 = vpop.f32.mrf.mxu0 }
 0x554   : > { %604 = vrot.lane.b32.xlu1 %v374_v25, %s961_s23 }
 0x555   : > { %v788_v26 = vpop.f32.mrf.mxu0 }
 0x557   : > { %v377_v27 = vpop.f32.mrf.mxu0 }
 0x559   : > { %v789_v28 = vpop.f32.mrf.mxu0 }
 0x588   : > { %v485_v0 = vpop.f32.mrf.mxu0 }
 0x589   : > { %608 = vrot.lane.b32.xlu0 %v485_v0, %s962_s29 }
 0x58a   : > { %899 = shalt.err (!%p896_p3)
}
 0x58b   : > { %s900_s6 = scalar_lea.hbm %s1111_s28, 128  ;;  %s904_s14 = scalar_lea.hbm %s1157_s2, 256 }
 0x58c   : > { %p901_p4 = scmp.ne.s32.totalorder %s1111_s28, %s900_s6  ;;  %p905_p9 = scmp.lt.s32.totalorder %s1111_s28, %s1157_s2 }
 0x58d   : > { %p906_p10 = scmp.lt.s32.totalorder %s904_s14, %s900_s6 }
 0x58e   : > { %p902_p7 = pnand %p901_p4, %p1018_p5 }
 0x58f   : > { %p907_p11 = por %p906_p10, %p905_p9 }
 0x590   : > { %p903_p8 = pneg %p902_p7 }
 0x592   : > { %p908_p12 = pnand %p907_p11, %p903_p8 }
 0x594   : > { %911 = shalt.err (!%p908_p12)
}
 0x595   : > { %814 = dma.vmem_to_hbm [thread:$0]  (%p1018_p5), %s647_s25, 128, %s1111_s28, %s630_s30   ;;  %v800_v29 = vpop.f32.mrf.mxu0  ;;  %vm616_vm3 = vcmask 130048   ;;  %vm618_vm4 = vcmask 195584   ;;  %vm621_vm5 = vcmask 257024  }
 0x596   : > { %s964_s23 = smov 24   ;;  %s149_s25 = scalar_lea.vmem %s1156_s1, %s734_s22 }
 0x597   : > { %v488_v30 = vpop.f32.mrf.mxu0 }
 0x599   : > { %v801_v31 = vpop.f32.mrf.mxu0 }
 0x59b   : > { %v596_v33 = vpop.f32.mrf.mxu0 }
 0x59c   : > { %612 = vrot.lane.b32.xlu1 %v596_v33, %s964_s23 }
 0x59d   : > { %v812_v34 = vpop.f32.mrf.mxu0 }
 0x59f   : > { %v599_v35 = vpop.f32.mrf.mxu0 }
 0x5a1   : > { %v813_v36 = vpop.f32.mrf.mxu0 }
 0x5c6   : > { %v605_v37 = vpop.permute.xlu1 %604 }
 0x5c7   : > { %v615_v39 = vsel %vm159_vm1, %v1079_v32, %v605_v37 }
 0x5fb   : > { %v609_v38 = vpop.permute.xlu0 %608 }
 0x5fc   : > { %v617_v40 = vsel %vm616_vm3, %v615_v39, %v609_v38 }
 0x60e   : > { %v613_v41 = vpop.permute.xlu1 %612 }
 0x60f   : > { %v619_v42 = vsel %vm618_vm4, %v617_v40, %v613_v41 }
 0x610   : > { %v620_v43 = vpack.c.bf16 %v619_v42, %v619_v42 }
 0x612   : > { %622 = vst.msk [vmem:[%s149_s25] sm:$0xf] %vm621_vm5, %v620_v43 }
 0x613 PF: > { %p820_p5 = scmp.ge.s32.totalorder %s946_s12, 2  ;;  %s665_s26 = sand.u32 1, %s934_s9  }
 0x614   : > { %s666_s27 = scalar_lea.sflag [#allocation3], %s665_s26 }
 0x615   : > { %p817_p13 = pnand %p820_p5, %p1022_p6 }
 0x617   : > { %p818_p0 = pneg %p817_p13 }
 0x619   : > { %929 = dma.done.wait (%p818_p0), %s666_s27, 128  }
 0x61a   : > { %931 = vsyncadd (%p818_p0), %s666_s27, 4294967168  ;;  %p13_p1 = scmp.ge.s32.totalorder %s1005_s15, 4   ;;  %s1160_s9 = smov %s938_s10 }
 0x61b   : > { %s1161_s10 = smov %s942_s11  ;;  %s1162_s11 = smov %s1016_s18 }
 0x61c   : > { %s1163_s12 = smov %s1005_s15  ;;  %15 = sbr.rel (!%p13_p1) target bundleno = 3 (0x3), region = 71 }
 0x621   :  { %671 = vsyncpa [#allocation3], 1 }
 0x622   :  { %673 = vsyncpa [#allocation3 + $0x1], 1 }

// kernel: self_attention_layer.5
= control target key start
LH: loop header
LB: loop body
LE: loop exit
PB: predicated region body
PF: predicated region fallthrough
CT: control target
= control target key end

     0   :  { %vm19_vm0 = vcmask 261120   ;;  %v129_v0 = vmov 0.0   ;;  %vm130_vm1 = vmmov 0   ;;  %s184_s1 = inlined_call_operand.vmem [shape: f32[32,32], index: 1, kind: input, shape index: {}]   ;;  %s185_s0 = inlined_call_operand.vmem [shape: bf16[16,32], index: 0, kind: input, shape index: {}]   ;;  %s186_s2 = inlined_call_operand.vmem [shape: f32[1,32], index: 2, kind: input, shape index: {}]   ;;  %s187_s3 = inlined_call_operand.vmem [shape: f32[16,32], index: 3, kind: output, shape index: {}]  }
   0x1   :  { %118 = vmatprep.subr.bf16.mxu0 %v129_v0  ;;  %v28_v1 = vld [vmem:[%s184_s1 + $0x10] sm:$0xff]  ;;  %v29_v2 = vld [vmem:[%s184_s1 + $0x18] sm:$0xff]  ;;  %20 = vst.msk [vmem:[#allocation2] sm:$0xff] %vm19_vm0, %v129_v0  ;;  %21 = vst.msk [vmem:[#allocation2 + $0x8] sm:$0xff] %vm19_vm0, %v129_v0  ;;  %122 = vmatprep.mubr.msk.bf16.mxu0 %vm130_vm1, %v129_v0 }
   0x2   :  { %v31_v3 = vpack.c.bf16 %v29_v2, %v28_v1  ;;  %v26_v4 = vld [vmem:[%s184_s1] sm:$0xff]  ;;  %v27_v5 = vld [vmem:[%s184_s1 + $0x8] sm:$0xff] }
   0x3   :  { %v30_v7 = vpack.c.bf16 %v27_v5, %v26_v4  ;;  %v128_v9 = vld [vmem:[%s185_s0] sm:$0xff]  }
   0x4   :  { %v45_v6 = vsel %vm19_vm0, %v31_v3, 0  ;;  %v114_v18 = vld [vmem:[%s186_s2] ss:$0 sm:$0xff] }
   0x5   :  { %119 = vmatpush3.bf16.xpose.msra.mxu0 %v45_v6  ;;  %v42_v8 = vsel %vm19_vm0, %v30_v7, 0 }
   0x6   :  { %120 = vmatprep.subr.bf16.mxu0 %v129_v0 }
   0x8   :  { %v22_v10 = vld [vmem:[#allocation2] sm:$0xff]  ;;  %v23_v14 = vld [vmem:[#allocation2 + $0x8] sm:$0xff] }
   0xd   :  { %121 = vmatpush3.bf16.xpose.msra.mxu0 %v42_v8 }
  0x14   :  { %123 = vmatmul.mubr.msk.bf16.vlgmr.msra.gmra.mxu0 %vm19_vm0, %v128_v9 }
  0xd4   :  { %v81_v11 = vpop.f32.mrf.mxu0 }
  0xd5   :  { %v88_v12 = vadd.f32 %v81_v11, %v22_v10 }
  0xd6   :  { %v124_v13 = vpop.f32.mrf.mxu0 }
  0xd7   :  { %90 = vst.msk [vmem:[#allocation2] sm:$0xff] %vm19_vm0, %v88_v12 }
  0xd8   :  { %v84_v15 = vpop.f32.mrf.mxu0 }
  0xd9   :  { %v89_v16 = vadd.f32 %v84_v15, %v23_v14 }
  0xda   :  { %v125_v17 = vpop.f32.mrf.mxu0 }
  0xdb   :  { %91 = vst.msk [vmem:[#allocation2 + $0x8] sm:$0xff] %vm19_vm0, %v89_v16 }
  0xde   :  { %v95_v19 = vld [vmem:[#allocation2] sm:$0xff] }
  0xdf   :  { %v104_v20 = vadd.f32 %v114_v18, %v95_v19 }
  0xe1   :  { %106 = vst.msk [vmem:[%s187_s3] sm:$0xff] %vm19_vm0, %v104_v20 }
  0xe2   :  { %v96_v21 = vld [vmem:[#allocation2 + $0x8] sm:$0xff] }
  0xe3   :  { %v105_v22 = vadd.f32 %v114_v18, %v96_v21 }
  0xe5   :  { %107 = vst.msk [vmem:[%s187_s3 + $0x8] sm:$0xff] %vm19_vm0, %v105_v22 }

</bundles_post_ra>
